<compile_context>
chip_gen: v5e
topology: v5e:2x2
jax: 0.10.0
libtpu: 0.0.40
codegen_flags: <defaults>
</compile_context>

<pallas_src>
import numpy as np
import jax
import jax.numpy as jnp
from jax.experimental import pallas as pl
from jax.experimental.pallas import tpu as pltpu

_LANE = 128
_SUB = 8
_MAX_TERMS_PER_CALL = 64          # keep custom-call operand counts sane


def _round_up(a, m):
    return -(-a // m) * m


def _padded_vmem_bytes(shape, dtype):
    """Approximate VMEM footprint of a full-array block ((sublane,lane)-padded)."""
    itemsize = int(np.dtype(dtype).itemsize)
    packing = max(1, 4 // itemsize)            # sub-32-bit dtypes pack along sublanes
    if len(shape) == 0:
        elems = _SUB * packing * _LANE
    elif len(shape) == 1:
        elems = _SUB * packing * _round_up(int(shape[0]), _LANE)
    else:
        lead = 1
        for d in shape[:-2]:
            lead *= int(d)
        elems = (lead
                 * _round_up(int(shape[-2]), _SUB * packing)
                 * _round_up(int(shape[-1]), _LANE))
    return elems * itemsize


def _vmem_plan():
    """Per-call VMEM limit + per-group input budget, gated on chip generation."""
    try:
        cap = int(pltpu.get_tpu_info().vmem_capacity_bytes)
    except Exception:
        cap = 64 * 1024 * 1024                 # assume the smallest (v7x) VMEM
    limit = min(cap * 3 // 4, 96 * 1024 * 1024)   # ~48 MiB on v7x, 96 MiB on v5e/v6e
    budget = limit // 3                           # headroom for f32 casts / temporaries
    return limit, budget


# ----------------------------- Pallas kernel --------------------------------

def _make_group_kernel(metas):
    """metas: tuple of (kind, weight); kind in {"l1", "sq"}; weight = coeff/numel.

    The kernel body is statically unrolled over the group's terms: each term's
    VMEM ref (original shape) is loaded, cast to f32, reduced, and its weighted
    contribution accumulated; the final scalar is written to a (1,1) SMEM out.
    """
    def kernel(*refs):
        o_ref = refs[-1]
        in_refs = refs[:-1]
        total = jnp.float32(0.0)
        i = 0
        for kind, w in metas:
            if kind == "l1":                       # coeff * mean(|a - b|)
                a = in_refs[i][...].astype(jnp.float32)
                b = in_refs[i + 1][...].astype(jnp.float32)
                i += 2
                total = total + jnp.float32(w) * jnp.sum(jnp.abs(a - b))
            else:                                  # coeff * mean((1 - x)^2)
                x = in_refs[i][...].astype(jnp.float32)
                i += 1
                d = 1.0 - x
                total = total + jnp.float32(w) * jnp.sum(d * d)
        o_ref[0, 0] = total
    return kernel


def _launch_group(group, vmem_limit):
    metas = []
    arrays = []
    for kind, coeff, arrs in group:
        n = int(arrs[0].size)
        metas.append((kind, float(coeff) / float(n)))
        arrays.extend(arrs)
    out = pl.pallas_call(
        _make_group_kernel(tuple(metas)),
        out_shape=jax.ShapeDtypeStruct((1, 1), jnp.float32),
        in_specs=[pl.BlockSpec(memory_space=pltpu.MemorySpace.VMEM)
                  for _ in arrays],
        out_specs=pl.BlockSpec(memory_space=pltpu.MemorySpace.SMEM),
        compiler_params=pltpu.CompilerParams(vmem_limit_bytes=vmem_limit),
    )(*arrays)
    return out[0, 0]


def _fused_mean_loss(terms):
    """sum_k coeff_k * mean(term_k), fused into as few pallas_call launches as
    fit the generation-gated VMEM budget (normally exactly one)."""
    # Guard against empty tensors (coeff / 0 would bake inf weights).
    terms = [t for t in terms if all(int(a.size) > 0 for a in t[2])]
    if not terms:
        return jnp.float32(0.0)

    vmem_limit, budget = _vmem_plan()
    groups, cur, cur_bytes = [], [], 0
    for t in terms:
        tb = sum(_padded_vmem_bytes(a.shape, a.dtype) for a in t[2])
        if cur and (cur_bytes + tb > budget or len(cur) >= _MAX_TERMS_PER_CALL):
            groups.append(cur)
            cur, cur_bytes = [], 0
        cur.append(t)
        cur_bytes += tb
    groups.append(cur)
    # TODO(synk): stream single tensors larger than the per-call VMEM budget
    # with a gridded / manual-DMA chunked path instead of one full-VMEM block.

    total = jnp.float32(0.0)
    for g in groups:
        total = total + _launch_group(g, vmem_limit)
    return total


# ------------------------------ public losses -------------------------------

def feature_loss(true_feats, pred_feats):
    terms = []
    for t_feat, p_feat in zip(true_feats, pred_feats):
        for tb, pb in zip(t_feat, p_feat):
            terms.append(("l1", 2.0, (tb, pb)))
    return _fused_mean_loss(terms)


def spectrogram_loss(spec, pred_spec):
    return _fused_mean_loss([("l1", 45.0, (spec, pred_spec))])


def generator_loss(spec, pred_spec,
                   mpd_pred_feats, mpd_true_feats,
                   msd_pred_feats, msd_true_feats,
                   mpd_pred, msd_pred):
    # Every term (L1 spectrogram, L1 feature maps, LSGAN predictions) goes into
    # one fused launch (split only if VMEM-budget-bound).
    terms = [("l1", 45.0, (spec, pred_spec))]
    for t_feat, p_feat in zip(mpd_true_feats, mpd_pred_feats):
        for tb, pb in zip(t_feat, p_feat):
            terms.append(("l1", 2.0, (tb, pb)))
    for t_feat, p_feat in zip(msd_true_feats, msd_pred_feats):
        for tb, pb in zip(t_feat, p_feat):
            terms.append(("l1", 2.0, (tb, pb)))
    for x in list(mpd_pred) + list(msd_pred):
        terms.append(("sq", 1.0, (x,)))
    return _fused_mean_loss(terms)


# ---------------------------- pure-JAX reference -----------------------------

def _ref_generator_loss(spec, pred_spec,
                        mpd_pred_feats, mpd_true_feats,
                        msd_pred_feats, msd_true_feats,
                        mpd_pred, msd_pred):
    def fl(true_feats, pred_feats):
        s = 0.0
        for t_feat, p_feat in zip(true_feats, pred_feats):
            for tb, pb in zip(t_feat, p_feat):
                s += jnp.mean(jnp.abs(tb.astype(jnp.float32)
                                      - pb.astype(jnp.float32)))
        return s * 2.0
    loss = jnp.mean(jnp.abs(spec.astype(jnp.float32)
                            - pred_spec.astype(jnp.float32))) * 45.0
    loss += fl(mpd_true_feats, mpd_pred_feats)
    loss += fl(msd_true_feats, msd_pred_feats)
    for x in mpd_pred:
        loss += jnp.mean((1.0 - x.astype(jnp.float32)) ** 2)
    for x in msd_pred:
        loss += jnp.mean((1.0 - x.astype(jnp.float32)) ** 2)
    return loss


# ------------------------------------ main ----------------------------------

if __name__ == "__main__":
    key = jax.random.PRNGKey(0)
    ks = iter(jax.random.split(key, 32))

    def rnd(shape):
        return jax.random.normal(next(ks), shape, dtype=jnp.float32)

    # Spectrograms: [B, n_mels, T]
    spec = rnd((2, 16, 16))
    pred_spec = rnd((2, 16, 16))

    # MPD features: list (per period-discriminator) of lists of NCHW maps.
    mpd_true_feats = [[rnd((2, 4, 8, 2)), rnd((2, 8, 4, 2))],
                      [rnd((2, 4, 6, 3)), rnd((2, 8, 3, 3))]]
    mpd_pred_feats = [[rnd(f.shape) for f in d] for d in mpd_true_feats]

    # MSD features: list (per scale-discriminator) of lists of NCT maps.
    msd_true_feats = [[rnd((2, 4, 64)), rnd((2, 8, 32))],
                      [rnd((2, 4, 32)), rnd((2, 8, 16))]]
    msd_pred_feats = [[rnd(f.shape) for f in d] for d in msd_true_feats]

    # Discriminator predictions.
    mpd_pred = [rnd((2, 1, 8, 2)), rnd((2, 1, 6, 3))]
    msd_pred = [rnd((2, 1, 32)), rnd((2, 1, 16))]

    loss_fn = jax.jit(generator_loss)
    out = loss_fn(spec, pred_spec,
                  mpd_pred_feats, mpd_true_feats,
                  msd_pred_feats, msd_true_feats,
                  mpd_pred, msd_pred)
    out = jax.block_until_ready(out)

    ref = _ref_generator_loss(spec, pred_spec,
                              mpd_pred_feats, mpd_true_feats,
                              msd_pred_feats, msd_true_feats,
                              mpd_pred, msd_pred)
    assert jnp.allclose(out, ref, rtol=1e-5, atol=1e-5), (out, ref)
    print("KERNEL_OK")
</pallas_src>

<mosaic_0001>
module attributes {stable_mosaic.version = 11 : i64} {
  func.func @kernel(%arg0: memref<2x16x16xf32, #tpu.memory_space<vmem>>, %arg1: memref<2x16x16xf32, #tpu.memory_space<vmem>>, %arg2: memref<2x4x8x2xf32, #tpu.memory_space<vmem>>, %arg3: memref<2x4x8x2xf32, #tpu.memory_space<vmem>>, %arg4: memref<2x8x4x2xf32, #tpu.memory_space<vmem>>, %arg5: memref<2x8x4x2xf32, #tpu.memory_space<vmem>>, %arg6: memref<2x4x6x3xf32, #tpu.memory_space<vmem>>, %arg7: memref<2x4x6x3xf32, #tpu.memory_space<vmem>>, %arg8: memref<2x8x3x3xf32, #tpu.memory_space<vmem>>, %arg9: memref<2x8x3x3xf32, #tpu.memory_space<vmem>>, %arg10: memref<2x4x64xf32, #tpu.memory_space<vmem>>, %arg11: memref<2x4x64xf32, #tpu.memory_space<vmem>>, %arg12: memref<2x8x32xf32, #tpu.memory_space<vmem>>, %arg13: memref<2x8x32xf32, #tpu.memory_space<vmem>>, %arg14: memref<2x4x32xf32, #tpu.memory_space<vmem>>, %arg15: memref<2x4x32xf32, #tpu.memory_space<vmem>>, %arg16: memref<2x8x16xf32, #tpu.memory_space<vmem>>, %arg17: memref<2x8x16xf32, #tpu.memory_space<vmem>>, %arg18: memref<2x1x8x2xf32, #tpu.memory_space<vmem>>, %arg19: memref<2x1x6x3xf32, #tpu.memory_space<vmem>>, %arg20: memref<2x1x32xf32, #tpu.memory_space<vmem>>, %arg21: memref<2x1x16xf32, #tpu.memory_space<vmem>>, %arg22: memref<1x1xf32, #tpu.memory_space<smem>>) attributes {dimension_semantics = [], scalar_prefetch = 0 : i64, scratch_operands = 0 : i64, tpu.core_type = #tpu.core_type<tc>} {
    %c0 = arith.constant 0 : index
    %c0_0 = arith.constant 0 : index
    %c0_1 = arith.constant 0 : index
    %0 = vector.load %arg0[%c0, %c0_0, %c0_1] : memref<2x16x16xf32, #tpu.memory_space<vmem>>, vector<2x16x16xf32>
    %c0_2 = arith.constant 0 : index
    %c0_3 = arith.constant 0 : index
    %c0_4 = arith.constant 0 : index
    %1 = vector.load %arg1[%c0_2, %c0_3, %c0_4] : memref<2x16x16xf32, #tpu.memory_space<vmem>>, vector<2x16x16xf32>
    %2 = arith.subf %0, %1 : vector<2x16x16xf32>
    %3 = math.absf %2 : vector<2x16x16xf32>
    %4 = vector.shape_cast %3 : vector<2x16x16xf32> to vector<1x2x16x16xf32>
    %cst = arith.constant dense<0.000000e+00> : vector<1xf32>
    %5 = vector.multi_reduction <add>, %4, %cst [1, 2, 3] : vector<1x2x16x16xf32> to vector<1xf32>
    %6 = vector.shape_cast %5 : vector<1xf32> to vector<1x1x1x1xf32>
    %7 = vector.extract %6[0, 0, 0, 0] : f32 from vector<1x1x1x1xf32>
    %cst_5 = arith.constant 0.087890625 : f32
    %8 = arith.mulf %cst_5, %7 : f32
    %cst_6 = arith.constant 0.000000e+00 : f32
    %9 = arith.addf %cst_6, %8 : f32
    %c0_7 = arith.constant 0 : index
    %c0_8 = arith.constant 0 : index
    %c0_9 = arith.constant 0 : index
    %c0_10 = arith.constant 0 : index
    %10 = vector.load %arg2[%c0_7, %c0_8, %c0_9, %c0_10] : memref<2x4x8x2xf32, #tpu.memory_space<vmem>>, vector<2x4x8x2xf32>
    %c0_11 = arith.constant 0 : index
    %c0_12 = arith.constant 0 : index
    %c0_13 = arith.constant 0 : index
    %c0_14 = arith.constant 0 : index
    %11 = vector.load %arg3[%c0_11, %c0_12, %c0_13, %c0_14] : memref<2x4x8x2xf32, #tpu.memory_space<vmem>>, vector<2x4x8x2xf32>
    %12 = arith.subf %10, %11 : vector<2x4x8x2xf32>
    %13 = math.absf %12 : vector<2x4x8x2xf32>
    %14 = vector.shape_cast %13 : vector<2x4x8x2xf32> to vector<1x2x4x8x2xf32>
    %cst_15 = arith.constant dense<0.000000e+00> : vector<1xf32>
    %15 = vector.multi_reduction <add>, %14, %cst_15 [1, 2, 3, 4] : vector<1x2x4x8x2xf32> to vector<1xf32>
    %16 = vector.shape_cast %15 : vector<1xf32> to vector<1x1x1x1x1xf32>
    %17 = vector.extract %16[0, 0, 0, 0, 0] : f32 from vector<1x1x1x1x1xf32>
    %cst_16 = arith.constant 1.562500e-02 : f32
    %18 = arith.mulf %cst_16, %17 : f32
    %19 = arith.addf %9, %18 : f32
    %c0_17 = arith.constant 0 : index
    %c0_18 = arith.constant 0 : index
    %c0_19 = arith.constant 0 : index
    %c0_20 = arith.constant 0 : index
    %20 = vector.load %arg4[%c0_17, %c0_18, %c0_19, %c0_20] : memref<2x8x4x2xf32, #tpu.memory_space<vmem>>, vector<2x8x4x2xf32>
    %c0_21 = arith.constant 0 : index
    %c0_22 = arith.constant 0 : index
    %c0_23 = arith.constant 0 : index
    %c0_24 = arith.constant 0 : index
    %21 = vector.load %arg5[%c0_21, %c0_22, %c0_23, %c0_24] : memref<2x8x4x2xf32, #tpu.memory_space<vmem>>, vector<2x8x4x2xf32>
    %22 = arith.subf %20, %21 : vector<2x8x4x2xf32>
    %23 = math.absf %22 : vector<2x8x4x2xf32>
    %24 = vector.shape_cast %23 : vector<2x8x4x2xf32> to vector<1x2x8x4x2xf32>
    %cst_25 = arith.constant dense<0.000000e+00> : vector<1xf32>
    %25 = vector.multi_reduction <add>, %24, %cst_25 [1, 2, 3, 4] : vector<1x2x8x4x2xf32> to vector<1xf32>
    %26 = vector.shape_cast %25 : vector<1xf32> to vector<1x1x1x1x1xf32>
    %27 = vector.extract %26[0, 0, 0, 0, 0] : f32 from vector<1x1x1x1x1xf32>
    %cst_26 = arith.constant 1.562500e-02 : f32
    %28 = arith.mulf %cst_26, %27 : f32
    %29 = arith.addf %19, %28 : f32
    %c0_27 = arith.constant 0 : index
    %c0_28 = arith.constant 0 : index
    %c0_29 = arith.constant 0 : index
    %c0_30 = arith.constant 0 : index
    %30 = vector.load %arg6[%c0_27, %c0_28, %c0_29, %c0_30] : memref<2x4x6x3xf32, #tpu.memory_space<vmem>>, vector<2x4x6x3xf32>
    %c0_31 = arith.constant 0 : index
    %c0_32 = arith.constant 0 : index
    %c0_33 = arith.constant 0 : index
    %c0_34 = arith.constant 0 : index
    %31 = vector.load %arg7[%c0_31, %c0_32, %c0_33, %c0_34] : memref<2x4x6x3xf32, #tpu.memory_space<vmem>>, vector<2x4x6x3xf32>
    %32 = arith.subf %30, %31 : vector<2x4x6x3xf32>
    %33 = math.absf %32 : vector<2x4x6x3xf32>
    %34 = vector.shape_cast %33 : vector<2x4x6x3xf32> to vector<1x2x4x6x3xf32>
    %cst_35 = arith.constant dense<0.000000e+00> : vector<1xf32>
    %35 = vector.multi_reduction <add>, %34, %cst_35 [1, 2, 3, 4] : vector<1x2x4x6x3xf32> to vector<1xf32>
    %36 = vector.shape_cast %35 : vector<1xf32> to vector<1x1x1x1x1xf32>
    %37 = vector.extract %36[0, 0, 0, 0, 0] : f32 from vector<1x1x1x1x1xf32>
    %cst_36 = arith.constant 0.013888889 : f32
    %38 = arith.mulf %cst_36, %37 : f32
    %39 = arith.addf %29, %38 : f32
    %c0_37 = arith.constant 0 : index
    %c0_38 = arith.constant 0 : index
    %c0_39 = arith.constant 0 : index
    %c0_40 = arith.constant 0 : index
    %40 = vector.load %arg8[%c0_37, %c0_38, %c0_39, %c0_40] : memref<2x8x3x3xf32, #tpu.memory_space<vmem>>, vector<2x8x3x3xf32>
    %c0_41 = arith.constant 0 : index
    %c0_42 = arith.constant 0 : index
    %c0_43 = arith.constant 0 : index
    %c0_44 = arith.constant 0 : index
    %41 = vector.load %arg9[%c0_41, %c0_42, %c0_43, %c0_44] : memref<2x8x3x3xf32, #tpu.memory_space<vmem>>, vector<2x8x3x3xf32>
    %42 = arith.subf %40, %41 : vector<2x8x3x3xf32>
    %43 = math.absf %42 : vector<2x8x3x3xf32>
    %44 = vector.shape_cast %43 : vector<2x8x3x3xf32> to vector<1x2x8x3x3xf32>
    %cst_45 = arith.constant dense<0.000000e+00> : vector<1xf32>
    %45 = vector.multi_reduction <add>, %44, %cst_45 [1, 2, 3, 4] : vector<1x2x8x3x3xf32> to vector<1xf32>
    %46 = vector.shape_cast %45 : vector<1xf32> to vector<1x1x1x1x1xf32>
    %47 = vector.extract %46[0, 0, 0, 0, 0] : f32 from vector<1x1x1x1x1xf32>
    %cst_46 = arith.constant 0.013888889 : f32
    %48 = arith.mulf %cst_46, %47 : f32
    %49 = arith.addf %39, %48 : f32
    %c0_47 = arith.constant 0 : index
    %c0_48 = arith.constant 0 : index
    %c0_49 = arith.constant 0 : index
    %50 = vector.load %arg10[%c0_47, %c0_48, %c0_49] : memref<2x4x64xf32, #tpu.memory_space<vmem>>, vector<2x4x64xf32>
    %c0_50 = arith.constant 0 : index
    %c0_51 = arith.constant 0 : index
    %c0_52 = arith.constant 0 : index
    %51 = vector.load %arg11[%c0_50, %c0_51, %c0_52] : memref<2x4x64xf32, #tpu.memory_space<vmem>>, vector<2x4x64xf32>
    %52 = arith.subf %50, %51 : vector<2x4x64xf32>
    %53 = math.absf %52 : vector<2x4x64xf32>
    %54 = vector.shape_cast %53 : vector<2x4x64xf32> to vector<1x2x4x64xf32>
    %cst_53 = arith.constant dense<0.000000e+00> : vector<1xf32>
    %55 = vector.multi_reduction <add>, %54, %cst_53 [1, 2, 3] : vector<1x2x4x64xf32> to vector<1xf32>
    %56 = vector.shape_cast %55 : vector<1xf32> to vector<1x1x1x1xf32>
    %57 = vector.extract %56[0, 0, 0, 0] : f32 from vector<1x1x1x1xf32>
    %cst_54 = arith.constant 3.906250e-03 : f32
    %58 = arith.mulf %cst_54, %57 : f32
    %59 = arith.addf %49, %58 : f32
    %c0_55 = arith.constant 0 : index
    %c0_56 = arith.constant 0 : index
    %c0_57 = arith.constant 0 : index
    %60 = vector.load %arg12[%c0_55, %c0_56, %c0_57] : memref<2x8x32xf32, #tpu.memory_space<vmem>>, vector<2x8x32xf32>
    %c0_58 = arith.constant 0 : index
    %c0_59 = arith.constant 0 : index
    %c0_60 = arith.constant 0 : index
    %61 = vector.load %arg13[%c0_58, %c0_59, %c0_60] : memref<2x8x32xf32, #tpu.memory_space<vmem>>, vector<2x8x32xf32>
    %62 = arith.subf %60, %61 : vector<2x8x32xf32>
    %63 = math.absf %62 : vector<2x8x32xf32>
    %64 = vector.shape_cast %63 : vector<2x8x32xf32> to vector<1x2x8x32xf32>
    %cst_61 = arith.constant dense<0.000000e+00> : vector<1xf32>
    %65 = vector.multi_reduction <add>, %64, %cst_61 [1, 2, 3] : vector<1x2x8x32xf32> to vector<1xf32>
    %66 = vector.shape_cast %65 : vector<1xf32> to vector<1x1x1x1xf32>
    %67 = vector.extract %66[0, 0, 0, 0] : f32 from vector<1x1x1x1xf32>
    %cst_62 = arith.constant 3.906250e-03 : f32
    %68 = arith.mulf %cst_62, %67 : f32
    %69 = arith.addf %59, %68 : f32
    %c0_63 = arith.constant 0 : index
    %c0_64 = arith.constant 0 : index
    %c0_65 = arith.constant 0 : index
    %70 = vector.load %arg14[%c0_63, %c0_64, %c0_65] : memref<2x4x32xf32, #tpu.memory_space<vmem>>, vector<2x4x32xf32>
    %c0_66 = arith.constant 0 : index
    %c0_67 = arith.constant 0 : index
    %c0_68 = arith.constant 0 : index
    %71 = vector.load %arg15[%c0_66, %c0_67, %c0_68] : memref<2x4x32xf32, #tpu.memory_space<vmem>>, vector<2x4x32xf32>
    %72 = arith.subf %70, %71 : vector<2x4x32xf32>
    %73 = math.absf %72 : vector<2x4x32xf32>
    %74 = vector.shape_cast %73 : vector<2x4x32xf32> to vector<1x2x4x32xf32>
    %cst_69 = arith.constant dense<0.000000e+00> : vector<1xf32>
    %75 = vector.multi_reduction <add>, %74, %cst_69 [1, 2, 3] : vector<1x2x4x32xf32> to vector<1xf32>
    %76 = vector.shape_cast %75 : vector<1xf32> to vector<1x1x1x1xf32>
    %77 = vector.extract %76[0, 0, 0, 0] : f32 from vector<1x1x1x1xf32>
    %cst_70 = arith.constant 7.812500e-03 : f32
    %78 = arith.mulf %cst_70, %77 : f32
    %79 = arith.addf %69, %78 : f32
    %c0_71 = arith.constant 0 : index
    %c0_72 = arith.constant 0 : index
    %c0_73 = arith.constant 0 : index
    %80 = vector.load %arg16[%c0_71, %c0_72, %c0_73] : memref<2x8x16xf32, #tpu.memory_space<vmem>>, vector<2x8x16xf32>
    %c0_74 = arith.constant 0 : index
    %c0_75 = arith.constant 0 : index
    %c0_76 = arith.constant 0 : index
    %81 = vector.load %arg17[%c0_74, %c0_75, %c0_76] : memref<2x8x16xf32, #tpu.memory_space<vmem>>, vector<2x8x16xf32>
    %82 = arith.subf %80, %81 : vector<2x8x16xf32>
    %83 = math.absf %82 : vector<2x8x16xf32>
    %84 = vector.shape_cast %83 : vector<2x8x16xf32> to vector<1x2x8x16xf32>
    %cst_77 = arith.constant dense<0.000000e+00> : vector<1xf32>
    %85 = vector.multi_reduction <add>, %84, %cst_77 [1, 2, 3] : vector<1x2x8x16xf32> to vector<1xf32>
    %86 = vector.shape_cast %85 : vector<1xf32> to vector<1x1x1x1xf32>
    %87 = vector.extract %86[0, 0, 0, 0] : f32 from vector<1x1x1x1xf32>
    %cst_78 = arith.constant 7.812500e-03 : f32
    %88 = arith.mulf %cst_78, %87 : f32
    %89 = arith.addf %79, %88 : f32
    %c0_79 = arith.constant 0 : index
    %c0_80 = arith.constant 0 : index
    %c0_81 = arith.constant 0 : index
    %c0_82 = arith.constant 0 : index
    %90 = vector.load %arg18[%c0_79, %c0_80, %c0_81, %c0_82] : memref<2x1x8x2xf32, #tpu.memory_space<vmem>>, vector<2x1x8x2xf32>
    %cst_83 = arith.constant 1.000000e+00 : f32
    %91 = vector.broadcast %cst_83 : f32 to vector<2x1x8x2xf32>
    %92 = arith.subf %91, %90 : vector<2x1x8x2xf32>
    %93 = arith.mulf %92, %92 : vector<2x1x8x2xf32>
    %94 = vector.shape_cast %93 : vector<2x1x8x2xf32> to vector<1x2x1x8x2xf32>
    %cst_84 = arith.constant dense<0.000000e+00> : vector<1xf32>
    %95 = vector.multi_reduction <add>, %94, %cst_84 [1, 2, 3, 4] : vector<1x2x1x8x2xf32> to vector<1xf32>
    %96 = vector.shape_cast %95 : vector<1xf32> to vector<1x1x1x1x1xf32>
    %97 = vector.extract %96[0, 0, 0, 0, 0] : f32 from vector<1x1x1x1x1xf32>
    %cst_85 = arith.constant 3.125000e-02 : f32
    %98 = arith.mulf %cst_85, %97 : f32
    %99 = arith.addf %89, %98 : f32
    %c0_86 = arith.constant 0 : index
    %c0_87 = arith.constant 0 : index
    %c0_88 = arith.constant 0 : index
    %c0_89 = arith.constant 0 : index
    %100 = vector.load %arg19[%c0_86, %c0_87, %c0_88, %c0_89] : memref<2x1x6x3xf32, #tpu.memory_space<vmem>>, vector<2x1x6x3xf32>
    %cst_90 = arith.constant 1.000000e+00 : f32
    %101 = vector.broadcast %cst_90 : f32 to vector<2x1x6x3xf32>
    %102 = arith.subf %101, %100 : vector<2x1x6x3xf32>
    %103 = arith.mulf %102, %102 : vector<2x1x6x3xf32>
    %104 = vector.shape_cast %103 : vector<2x1x6x3xf32> to vector<1x2x1x6x3xf32>
    %cst_91 = arith.constant dense<0.000000e+00> : vector<1xf32>
    %105 = vector.multi_reduction <add>, %104, %cst_91 [1, 2, 3, 4] : vector<1x2x1x6x3xf32> to vector<1xf32>
    %106 = vector.shape_cast %105 : vector<1xf32> to vector<1x1x1x1x1xf32>
    %107 = vector.extract %106[0, 0, 0, 0, 0] : f32 from vector<1x1x1x1x1xf32>
    %cst_92 = arith.constant 0.027777778 : f32
    %108 = arith.mulf %cst_92, %107 : f32
    %109 = arith.addf %99, %108 : f32
    %c0_93 = arith.constant 0 : index
    %c0_94 = arith.constant 0 : index
    %c0_95 = arith.constant 0 : index
    %110 = vector.load %arg20[%c0_93, %c0_94, %c0_95] : memref<2x1x32xf32, #tpu.memory_space<vmem>>, vector<2x1x32xf32>
    %cst_96 = arith.constant 1.000000e+00 : f32
    %111 = vector.broadcast %cst_96 : f32 to vector<2x1x32xf32>
    %112 = arith.subf %111, %110 : vector<2x1x32xf32>
    %113 = arith.mulf %112, %112 : vector<2x1x32xf32>
    %114 = vector.shape_cast %113 : vector<2x1x32xf32> to vector<1x2x1x32xf32>
    %cst_97 = arith.constant dense<0.000000e+00> : vector<1xf32>
    %115 = vector.multi_reduction <add>, %114, %cst_97 [1, 2, 3] : vector<1x2x1x32xf32> to vector<1xf32>
    %116 = vector.shape_cast %115 : vector<1xf32> to vector<1x1x1x1xf32>
    %117 = vector.extract %116[0, 0, 0, 0] : f32 from vector<1x1x1x1xf32>
    %cst_98 = arith.constant 1.562500e-02 : f32
    %118 = arith.mulf %cst_98, %117 : f32
    %119 = arith.addf %109, %118 : f32
    %c0_99 = arith.constant 0 : index
    %c0_100 = arith.constant 0 : index
    %c0_101 = arith.constant 0 : index
    %120 = vector.load %arg21[%c0_99, %c0_100, %c0_101] : memref<2x1x16xf32, #tpu.memory_space<vmem>>, vector<2x1x16xf32>
    %cst_102 = arith.constant 1.000000e+00 : f32
    %121 = vector.broadcast %cst_102 : f32 to vector<2x1x16xf32>
    %122 = arith.subf %121, %120 : vector<2x1x16xf32>
    %123 = arith.mulf %122, %122 : vector<2x1x16xf32>
    %124 = vector.shape_cast %123 : vector<2x1x16xf32> to vector<1x2x1x16xf32>
    %cst_103 = arith.constant dense<0.000000e+00> : vector<1xf32>
    %125 = vector.multi_reduction <add>, %124, %cst_103 [1, 2, 3] : vector<1x2x1x16xf32> to vector<1xf32>
    %126 = vector.shape_cast %125 : vector<1xf32> to vector<1x1x1x1xf32>
    %127 = vector.extract %126[0, 0, 0, 0] : f32 from vector<1x1x1x1xf32>
    %cst_104 = arith.constant 3.125000e-02 : f32
    %128 = arith.mulf %cst_104, %127 : f32
    %129 = arith.addf %119, %128 : f32
    %c0_105 = arith.constant 0 : index
    %c0_106 = arith.constant 0 : index
    %130 = memref.load %arg22[%c0_105, %c0_106] : memref<1x1xf32, #tpu.memory_space<smem>>
    memref.store %129, %arg22[%c0_105, %c0_106] : memref<1x1xf32, #tpu.memory_space<smem>>
    return
  }
}

</mosaic_0001>

<bundles_post_ra>
// kernel: generator_loss.1
= control target key start
LH: loop header
LB: loop body
LE: loop exit
PB: predicated region body
PF: predicated region fallthrough
CT: control target
= control target key end

     0   :  { %s1241_s0 = inlined_call_operand.vmem [shape: f32[2,16,16], index: 0, kind: input, shape index: {}]   ;;  %s1242_s1 = inlined_call_operand.vmem [shape: f32[2,16,16], index: 1, kind: input, shape index: {}]   ;;  %s1243_s2 = inlined_call_operand.vmem [shape: f32[2,4,8,2], index: 2, kind: input, shape index: {}]   ;;  %s1244_s3 = inlined_call_operand.vmem [shape: f32[2,4,8,2], index: 3, kind: input, shape index: {}]   ;;  %s1245_s4 = inlined_call_operand.vmem [shape: f32[2,8,4,2], index: 4, kind: input, shape index: {}]   ;;  %s1246_s5 = inlined_call_operand.vmem [shape: f32[2,8,4,2], index: 5, kind: input, shape index: {}]   ;;  %s1247_s6 = inlined_call_operand.vmem [shape: f32[2,4,6,3], index: 6, kind: input, shape index: {}]   ;;  %s1248_s7 = inlined_call_operand.vmem [shape: f32[2,4,6,3], index: 7, kind: input, shape index: {}]   ;;  %s1249_s8 = inlined_call_operand.vmem [shape: f32[2,8,3,3], index: 8, kind: input, shape index: {}]   ;;  %s1250_s9 = inlined_call_operand.vmem [shape: f32[2,8,3,3], index: 9, kind: input, shape index: {}]   ;;  %s1251_s10 = inlined_call_operand.vmem [shape: f32[2,4,64], index: 10, kind: input, shape index: {}]   ;;  %s1252_s11 = inlined_call_operand.vmem [shape: f32[2,4,64], index: 11, kind: input, shape index: {}]   ;;  %s1253_s12 = inlined_call_operand.vmem [shape: f32[2,8,32], index: 12, kind: input, shape index: {}]   ;;  %s1254_s13 = inlined_call_operand.vmem [shape: f32[2,8,32], index: 13, kind: input, shape index: {}]   ;;  %s1255_s14 = inlined_call_operand.vmem [shape: f32[2,4,32], index: 14, kind: input, shape index: {}]   ;;  %s1256_s15 = inlined_call_operand.vmem [shape: f32[2,4,32], index: 15, kind: input, shape index: {}]   ;;  %s1257_s16 = inlined_call_operand.vmem [shape: f32[2,8,16], index: 16, kind: input, shape index: {}]   ;;  %s1258_s17 = inlined_call_operand.vmem [shape: f32[2,8,16], index: 17, kind: input, shape index: {}]   ;;  %s1259_s18 = inlined_call_operand.vmem [shape: f32[2,1,8,2], index: 18, kind: input, shape index: {}]   ;;  %s1260_s19 = inlined_call_operand.vmem [shape: f32[2,1,6,3], index: 19, kind: input, shape index: {}]   ;;  %s1261_s20 = inlined_call_operand.vmem [shape: f32[2,1,32], index: 20, kind: input, shape index: {}]   ;;  %s1262_s21 = inlined_call_operand.vmem [shape: f32[2,1,16], index: 21, kind: input, shape index: {}]   ;;  %s1263_s22 = inlined_call_operand.hbm [shape: f32[1,1], index: 22, kind: output, shape index: {}]  }
   0x1   :  { %1271 = sst [smem:[#allocation5_spill]] %s1241_s0 }
   0x2   :  { %1272 = sst [smem:[#allocation6_spill]] %s1242_s1 }
   0x3   :  { %1273 = sst [smem:[#allocation7_spill]] %s1243_s2 }
   0x4   :  { %1274 = sst [smem:[#allocation8_spill]] %s1244_s3 }
   0x5   :  { %1275 = sst [smem:[#allocation9_spill]] %s1245_s4 }
   0x6   :  { %1276 = sst [smem:[#allocation10_spill]] %s1246_s5 }
   0x7   :  { %1277 = sst [smem:[#allocation11_spill]] %s1247_s6 }
   0x8   :  { %s1278_s29 = sld [smem:[#allocation5_spill]]  ;;  %vm88_vm0 = vcmask 130048   ;;  %vm139_vm1 = vcmask 15360   ;;  %vm305_vm2 = vcmask 21504   ;;  %vm447_vm3 = vcmask 519168  }
   0x9   :  { %s1279_s25 = sld [smem:[#allocation6_spill]]  ;;  %vm470_vm4 = vcmask 261120   ;;  %vm396_vm5 = vcmask 18432   ;;  %vm230_vm6 = vcmask 11264  }
   0xa   :  { %s1280_s0 = sld [smem:[#allocation7_spill]] }
   0xb   :  { %s1281_s5 = sld [smem:[#allocation8_spill]] }
   0xc   :  { %s1282_s26 = sld [smem:[#allocation11_spill]] }
   0xd   :  { %s1284_s28 = sld [smem:[#allocation10_spill]] }
   0xe   :  { %v72_v0 = vld [vmem:[%s1278_s29] sm:$0xff]  ;;  %v73_v1 = vld [vmem:[%s1278_s29 + $0x8] sm:$0xff]  ;;  %v74_v2 = vld [vmem:[%s1278_s29 + $0x10] sm:$0xff] }
   0xf   :  { %v75_v3 = vld [vmem:[%s1278_s29 + $0x18] sm:$0xff]  ;;  %v76_v4 = vld [vmem:[%s1279_s25] sm:$0xff]  ;;  %v77_v5 = vld [vmem:[%s1279_s25 + $0x8] sm:$0xff] }
  0x10   :  { %v78_v6 = vld [vmem:[%s1279_s25 + $0x10] sm:$0xff]  ;;  %v79_v7 = vld [vmem:[%s1279_s25 + $0x18] sm:$0xff]  ;;  %v80_v8 = vsub.f32 %v72_v0, %v76_v4  ;;  %v81_v9 = vsub.f32 %v73_v1, %v77_v5  ;;  %v107_v10 = vld [vmem:[%s1280_s0] sm:$0xff] }
  0x11   :  { %v82_v11 = vsub.f32 %v74_v2, %v78_v6  ;;  %v83_v12 = vsub.f32 %v75_v3, %v79_v7  ;;  %v108_v13 = vld [vmem:[%s1280_s0 + $0x8] sm:$0xff]  ;;  %v109_v14 = vld [vmem:[%s1280_s0 + $0x10] sm:$0xff]  ;;  %v110_v15 = vld [vmem:[%s1280_s0 + $0x18] sm:$0xff] }
  0x12   :  { %v84_v16 = vand.u32 2147483647, %v80_v8  ;;  %v85_v17 = vand.u32 2147483647, %v81_v9  ;;  %v111_v18 = vld [vmem:[%s1280_s0 + $0x20] sm:$0xff]  ;;  %v112_v19 = vld [vmem:[%s1280_s0 + $0x28] sm:$0xff] }
  0x13   :  { %v86_v20 = vand.u32 2147483647, %v82_v11  ;;  %v87_v21 = vand.u32 2147483647, %v83_v12  ;;  %v113_v22 = vld [vmem:[%s1280_s0 + $0x30] sm:$0xff]  ;;  %v114_v23 = vld [vmem:[%s1280_s0 + $0x38] sm:$0xff] }
  0x14   :  { %v89_v24 = vsel %vm88_vm0, %v84_v16, 0.0  ;;  %v90_v25 = vsel %vm88_vm0, %v85_v17, 0.0  ;;  %v115_v26 = vld [vmem:[%s1281_s5] sm:$0xff]  ;;  %v116_v27 = vld [vmem:[%s1281_s5 + $0x8] sm:$0xff]  ;;  %v117_v28 = vld [vmem:[%s1281_s5 + $0x10] sm:$0xff]  ;;  %s1283_s0 = sld [smem:[#allocation9_spill]] }
  0x15   :  { %v91_v29 = vadd.f32 %v90_v25, %v89_v24  ;;  %v92_v30 = vsel %vm88_vm0, %v86_v20, 0.0  ;;  %v94_v31 = vsel %vm88_vm0, %v87_v21, 0.0  ;;  %v118_v32 = vld [vmem:[%s1281_s5 + $0x18] sm:$0xff]  ;;  %v119_v33 = vld [vmem:[%s1281_s5 + $0x20] sm:$0xff]  ;;  %v120_v34 = vld [vmem:[%s1281_s5 + $0x28] sm:$0xff]  ;;  %v123_v35 = vsub.f32 %v107_v10, %v115_v26 }
  0x16   :  { %v121_v36 = vld [vmem:[%s1281_s5 + $0x30] sm:$0xff]  ;;  %v122_v37 = vld [vmem:[%s1281_s5 + $0x38] sm:$0xff]  ;;  %v124_v38 = vsub.f32 %v108_v13, %v116_v27  ;;  %v125_v39 = vsub.f32 %v109_v14, %v117_v28  ;;  %v126_v40 = vsub.f32 %v110_v15, %v118_v32  ;;  %v127_v41 = vsub.f32 %v111_v18, %v119_v33  ;;  %v273_v53 = vld [vmem:[%s1282_s26] sm:$0x3f] }
  0x17   :  { %v93_v42 = vadd.f32 %v92_v30, %v91_v29  ;;  %v128_v43 = vsub.f32 %v112_v19, %v120_v34  ;;  %v129_v44 = vsub.f32 %v113_v22, %v121_v36  ;;  %v130_v45 = vsub.f32 %v114_v23, %v122_v37  ;;  %v274_v58 = vld [vmem:[%s1282_s26 + $0x8] sm:$0x3f]  ;;  %v275_v59 = vld [vmem:[%s1282_s26 + $0x10] sm:$0x3f]  ;;  %v276_v63 = vld [vmem:[%s1282_s26 + $0x18] sm:$0x3f] }
  0x18   :  { %v131_v46 = vand.u32 2147483647, %v123_v35  ;;  %v132_v47 = vand.u32 2147483647, %v124_v38  ;;  %v133_v48 = vand.u32 2147483647, %v125_v39 }
  0x19   :  { %v95_v49 = vadd.f32 %v94_v31, %v93_v42  ;;  %v134_v50 = vand.u32 2147483647, %v126_v40  ;;  %v135_v51 = vand.u32 2147483647, %v127_v41  ;;  %v136_v52 = vand.u32 2147483647, %v128_v43 }
  0x1a   :  { %v137_v54 = vand.u32 2147483647, %v129_v44  ;;  %v138_v55 = vand.u32 2147483647, %v130_v45  ;;  %v140_v56 = vsel %vm139_vm1, %v131_v46, 0.0  ;;  %v141_v57 = vsel %vm139_vm1, %v132_v47, 0.0 }
  0x1b   :  { %96 = vadd.xlane.f32.xlu0 %v95_v49  ;;  %v142_v60 = vadd.f32 %v141_v57, %v140_v56  ;;  %v143_v61 = vsel %vm139_vm1, %v133_v48, 0.0  ;;  %v145_v62 = vsel %vm139_vm1, %v134_v50, 0.0  ;;  %v277_v0 = vld [vmem:[%s1282_s26 + $0x20] sm:$0x3f]  ;;  %v147_v1 = vsel %vm139_vm1, %v135_v51, 0.0  ;;  %v463_v34 = vld [vmem:[%s1253_s12 + $0x8] sm:$0xff] }
  0x1c   :  { %v149_v2 = vsel %vm139_vm1, %v136_v52, 0.0  ;;  %v151_v3 = vsel %vm139_vm1, %v137_v54, 0.0  ;;  %v153_v4 = vsel %vm139_vm1, %v138_v55, 0.0  ;;  %v278_v5 = vld [vmem:[%s1282_s26 + $0x28] sm:$0x3f]  ;;  %v462_v30 = vld [vmem:[%s1253_s12] sm:$0xff] }
  0x1d   :  { %v144_v6 = vadd.f32 %v143_v61, %v142_v60  ;;  %v279_v7 = vld [vmem:[%s1282_s26 + $0x30] sm:$0x3f]  ;;  %v280_v8 = vld [vmem:[%s1282_s26 + $0x38] sm:$0x3f]  ;;  %v281_v9 = vld [vmem:[%s1248_s7] sm:$0x3f] }
  0x1e   :  { %v282_v10 = vld [vmem:[%s1248_s7 + $0x8] sm:$0x3f]  ;;  %v283_v11 = vld [vmem:[%s1248_s7 + $0x10] sm:$0x3f]  ;;  %v284_v12 = vld [vmem:[%s1248_s7 + $0x18] sm:$0x3f]  ;;  %v289_v13 = vsub.f32 %v273_v53, %v281_v9 }
  0x1f   :  { %v146_v14 = vadd.f32 %v145_v62, %v144_v6  ;;  %v285_v15 = vld [vmem:[%s1248_s7 + $0x20] sm:$0x3f]  ;;  %v286_v16 = vld [vmem:[%s1248_s7 + $0x28] sm:$0x3f]  ;;  %v287_v17 = vld [vmem:[%s1248_s7 + $0x30] sm:$0x3f]  ;;  %v290_v18 = vsub.f32 %v274_v58, %v282_v10  ;;  %v291_v19 = vsub.f32 %v275_v59, %v283_v11  ;;  %v292_v20 = vsub.f32 %v276_v63, %v284_v12 }
  0x20   :  { %v288_v21 = vld [vmem:[%s1248_s7 + $0x38] sm:$0x3f]  ;;  %v293_v22 = vsub.f32 %v277_v0, %v285_v15  ;;  %v294_v23 = vsub.f32 %v278_v5, %v286_v16  ;;  %v295_v24 = vsub.f32 %v279_v7, %v287_v17  ;;  %v297_v25 = vand.u32 2147483647, %v289_v13  ;;  %v439_v32 = vld [vmem:[%s1251_s10] sm:$0xf] }
  0x21   :  { %v148_v26 = vadd.f32 %v147_v1, %v146_v14  ;;  %v296_v27 = vsub.f32 %v280_v8, %v288_v21  ;;  %v298_v28 = vand.u32 2147483647, %v290_v18  ;;  %v299_v29 = vand.u32 2147483647, %v291_v19  ;;  %v440_v33 = vld [vmem:[%s1251_s10 + $0x4] sm:$0xf] }
  0x22   :  { %v300_v31 = vand.u32 2147483647, %v292_v20  ;;  %v301_v36 = vand.u32 2147483647, %v293_v22  ;;  %v302_v37 = vand.u32 2147483647, %v294_v23 }
  0x23   :  { %v150_v35 = vadd.f32 %v149_v2, %v148_v26  ;;  %v306_v38 = vsel %vm305_vm2, %v297_v25, 0.0  ;;  %v464_v39 = vld [vmem:[%s1254_s13] sm:$0xff]  ;;  %v303_v40 = vand.u32 2147483647, %v295_v24  ;;  %v307_v41 = vsel %vm305_vm2, %v298_v28, 0.0  ;;  %v465_v48 = vld [vmem:[%s1254_s13 + $0x8] sm:$0xff] }
  0x24   :  { %v309_v42 = vsel %vm305_vm2, %v299_v29, 0.0  ;;  %v441_v43 = vld [vmem:[%s1252_s11] sm:$0xf]  ;;  %v304_v45 = vand.u32 2147483647, %v296_v27  ;;  %v308_v46 = vadd.f32 %v307_v41, %v306_v38  ;;  %v311_v49 = vsel %vm305_vm2, %v300_v31, 0.0 }
  0x25   :  { %v152_v44 = vadd.f32 %v151_v3, %v150_v35  ;;  %v442_v47 = vld [vmem:[%s1252_s11 + $0x4] sm:$0xf]  ;;  %v443_v50 = vsub.f32 %v439_v32, %v441_v43  ;;  %v466_v52 = vsub.f32 %v462_v30, %v464_v39  ;;  %v313_v55 = vsel %vm305_vm2, %v301_v36, 0.0  ;;  %v332_v9 = vld [vmem:[%s1249_s8] sm:$0x7] }
  0x26   :  { %v444_v51 = vsub.f32 %v440_v33, %v442_v47  ;;  %v310_v54 = vadd.f32 %v309_v42, %v308_v46  ;;  %v467_v56 = vsub.f32 %v463_v34, %v465_v48  ;;  %v315_v62 = vsel %vm305_vm2, %v302_v37, 0.0  ;;  %v333_v10 = vld [vmem:[%s1249_s8 + $0x4] sm:$0x7]  ;;  %v334_v11 = vld [vmem:[%s1249_s8 + $0x8] sm:$0x7] }
  0x27   :  { %v154_v53 = vadd.f32 %v153_v4, %v152_v44  ;;  %v445_v57 = vand.u32 2147483647, %v443_v50  ;;  %v468_v59 = vand.u32 2147483647, %v466_v52  ;;  %v317_v5 = vsel %vm305_vm2, %v303_v40, 0.0 }
  0x28   :  { %v446_v58 = vand.u32 2147483647, %v444_v51  ;;  %v312_v60 = vadd.f32 %v311_v49, %v310_v54  ;;  %v469_v61 = vand.u32 2147483647, %v467_v56  ;;  %v319_v6 = vsel %vm305_vm2, %v304_v45, 0.0 }
  0x29   :  { %155 = vadd.xlane.f32.xlu0 %v154_v53  ;;  %v448_v63 = vsel %vm447_vm3, %v445_v57, 0.0  ;;  %v471_v1 = vsel %vm470_vm4, %v468_v59, 0.0  ;;  %v348_v12 = vld [vmem:[%s1250_s9] sm:$0x7]  ;;  %v349_v13 = vld [vmem:[%s1250_s9 + $0x4] sm:$0x7] }
  0x2a   :  { %v449_v0 = vsel %vm447_vm3, %v446_v58, 0.0  ;;  %v314_v2 = vadd.f32 %v313_v55, %v312_v60  ;;  %v472_v4 = vsel %vm470_vm4, %v469_v61, 0.0  ;;  %v350_v14 = vld [vmem:[%s1250_s9 + $0x8] sm:$0x7]  ;;  %v335_v16 = vld [vmem:[%s1249_s8 + $0xc] sm:$0x7]  ;;  %v364_v19 = vsub.f32 %v332_v9, %v348_v12 }
  0x2b   :  { %v450_v3 = vadd.f32 %v449_v0, %v448_v63  ;;  %v473_v8 = vadd.f32 %v472_v4, %v471_v1  ;;  %v351_v17 = vld [vmem:[%s1250_s9 + $0xc] sm:$0x7]  ;;  %v365_v20 = vsub.f32 %v333_v10, %v349_v13  ;;  %v366_v21 = vsub.f32 %v334_v11, %v350_v14  ;;  %v336_v22 = vld [vmem:[%s1249_s8 + $0x10] sm:$0x7]  ;;  %v337_v24 = vld [vmem:[%s1249_s8 + $0x14] sm:$0x7] }
  0x2c   :  { %v316_v7 = vadd.f32 %v315_v62, %v314_v2  ;;  %v352_v23 = vld [vmem:[%s1250_s9 + $0x10] sm:$0x7]  ;;  %v338_v25 = vld [vmem:[%s1249_s8 + $0x18] sm:$0x7]  ;;  %v367_v26 = vsub.f32 %v335_v16, %v351_v17  ;;  %v353_v27 = vld [vmem:[%s1250_s9 + $0x14] sm:$0x7] }
  0x2d   :  { %451 = vadd.xlane.f32.xlu2 %v450_v3  ;;  %v354_v28 = vld [vmem:[%s1250_s9 + $0x18] sm:$0x7]  ;;  %v339_v29 = vld [vmem:[%s1249_s8 + $0x1c] sm:$0x7]  ;;  %v340_v30 = vld [vmem:[%s1249_s8 + $0x20] sm:$0x7]  ;;  %v368_v32 = vsub.f32 %v336_v22, %v352_v23  ;;  %v369_v44 = vsub.f32 %v337_v24, %v353_v27 }
  0x2e   :  { %v318_v15 = vadd.f32 %v317_v5, %v316_v7  ;;  %v341_v31 = vld [vmem:[%s1249_s8 + $0x24] sm:$0x7]  ;;  %v380_v33 = vand.u32 2147483647, %v364_v19  ;;  %v381_v34 = vand.u32 2147483647, %v365_v20  ;;  %v370_v49 = vsub.f32 %v338_v25, %v354_v28 }
  0x2f   :  { %v382_v35 = vand.u32 2147483647, %v366_v21  ;;  %v342_v36 = vld [vmem:[%s1249_s8 + $0x28] sm:$0x7]  ;;  %v343_v37 = vld [vmem:[%s1249_s8 + $0x2c] sm:$0x7] }
  0x30   :  { %v320_v18 = vadd.f32 %v319_v6, %v318_v15  ;;  %v355_v38 = vld [vmem:[%s1250_s9 + $0x1c] sm:$0x7]  ;;  %v356_v39 = vld [vmem:[%s1250_s9 + $0x20] sm:$0x7]  ;;  %v344_v40 = vld [vmem:[%s1249_s8 + $0x30] sm:$0x7] }
  0x31   :  { %474 = vadd.xlane.f32.xlu0 %v473_v8  ;;  %v345_v41 = vld [vmem:[%s1249_s8 + $0x34] sm:$0x7]  ;;  %v357_v42 = vld [vmem:[%s1250_s9 + $0x24] sm:$0x7]  ;;  %v358_v43 = vld [vmem:[%s1250_s9 + $0x28] sm:$0x7]  ;;  %v371_v56 = vsub.f32 %v339_v29, %v355_v38  ;;  %v372_v57 = vsub.f32 %v340_v30, %v356_v39 }
  0x32   :  { %321 = vadd.xlane.f32.xlu1 %v320_v18  ;;  %v383_v45 = vand.u32 2147483647, %v367_v26  ;;  %v359_v46 = vld [vmem:[%s1250_s9 + $0x2c] sm:$0x7]  ;;  %v360_v47 = vld [vmem:[%s1250_s9 + $0x30] sm:$0x7]  ;;  %v373_v58 = vsub.f32 %v341_v31, %v357_v42  ;;  %v374_v60 = vsub.f32 %v342_v36, %v358_v43 }
  0x33   :  { %v361_v48 = vld [vmem:[%s1250_s9 + $0x34] sm:$0x7]  ;;  %v384_v50 = vand.u32 2147483647, %v368_v32  ;;  %v397_v51 = vsel %vm396_vm5, %v380_v33, 0.0  ;;  %v398_v52 = vsel %vm396_vm5, %v381_v34, 0.0  ;;  %v375_v61 = vsub.f32 %v343_v37, %v359_v46 }
  0x34   :  { %v400_v53 = vsel %vm396_vm5, %v382_v35, 0.0  ;;  %v346_v54 = vld [vmem:[%s1249_s8 + $0x38] sm:$0x7]  ;;  %v399_v59 = vadd.f32 %v398_v52, %v397_v51  ;;  %v385_v62 = vand.u32 2147483647, %v369_v44  ;;  %v402_v63 = vsel %vm396_vm5, %v383_v45, 0.0 }
  0x35   :  { %v362_v55 = vld [vmem:[%s1250_s9 + $0x38] sm:$0x7]  ;;  %v347_v0 = vld [vmem:[%s1249_s8 + $0x3c] sm:$0x7]  ;;  %v376_v1 = vsub.f32 %v344_v40, %v360_v47  ;;  %v377_v2 = vsub.f32 %v345_v41, %v361_v48  ;;  %v386_v6 = vand.u32 2147483647, %v370_v49 }
  0x36   :  { %v401_v3 = vadd.f32 %v400_v53, %v399_v59  ;;  %v363_v4 = vld [vmem:[%s1250_s9 + $0x3c] sm:$0x7]  ;;  %v378_v5 = vsub.f32 %v346_v54, %v362_v55  ;;  %v404_v7 = vsel %vm396_vm5, %v384_v50, 0.0  ;;  %v387_v8 = vand.u32 2147483647, %v371_v56 }
  0x37   :  { %v388_v9 = vand.u32 2147483647, %v372_v57  ;;  %v389_v10 = vand.u32 2147483647, %v373_v58  ;;  %v390_v12 = vand.u32 2147483647, %v374_v60  ;;  %v379_v16 = vsub.f32 %v347_v0, %v363_v4 }
  0x38   :  { %v403_v11 = vadd.f32 %v402_v63, %v401_v3  ;;  %v391_v13 = vand.u32 2147483647, %v375_v61  ;;  %v406_v14 = vsel %vm396_vm5, %v385_v62, 0.0  ;;  %v166_v15 = vld [vmem:[%s1283_s0] sm:$0xf]  ;;  %v408_v21 = vsel %vm396_vm5, %v386_v6, 0.0 }
  0x39   :  { %v392_v17 = vand.u32 2147483647, %v376_v1  ;;  %v393_v18 = vand.u32 2147483647, %v377_v2  ;;  %v167_v20 = vld [vmem:[%s1283_s0 + $0x4] sm:$0xf] }
  0x3a   :  { %v405_v19 = vadd.f32 %v404_v7, %v403_v11  ;;  %v182_v22 = vld [vmem:[%s1284_s28] sm:$0xf]  ;;  %v183_v23 = vld [vmem:[%s1284_s28 + $0x4] sm:$0xf]  ;;  %v394_v24 = vand.u32 2147483647, %v378_v5 }
  0x3b   :  { %v168_v26 = vld [vmem:[%s1283_s0 + $0x8] sm:$0xf]  ;;  %v410_v28 = vsel %vm396_vm5, %v387_v8, 0.0  ;;  %v169_v29 = vld [vmem:[%s1283_s0 + $0xc] sm:$0xf]  ;;  %v198_v33 = vsub.f32 %v166_v15, %v182_v22  ;;  %v199_v34 = vsub.f32 %v167_v20, %v183_v23  ;;  %v412_v35 = vsel %vm396_vm5, %v388_v9, 0.0 }
  0x3c   :  { %v407_v25 = vadd.f32 %v406_v14, %v405_v19  ;;  %v184_v27 = vld [vmem:[%s1284_s28 + $0x8] sm:$0xf]  ;;  %v185_v30 = vld [vmem:[%s1284_s28 + $0xc] sm:$0xf]  ;;  %v395_v31 = vand.u32 2147483647, %v379_v16 }
  0x3d   :  { %v414_v36 = vsel %vm396_vm5, %v389_v10, 0.0  ;;  %v170_v37 = vld [vmem:[%s1283_s0 + $0x10] sm:$0xf]  ;;  %v200_v39 = vsub.f32 %v168_v26, %v184_v27  ;;  %v416_v41 = vsel %vm396_vm5, %v390_v12, 0.0  ;;  %v418_v42 = vsel %vm396_vm5, %v391_v13, 0.0 }
  0x3e   :  { %v409_v32 = vadd.f32 %v408_v21, %v407_v25  ;;  %v186_v38 = vld [vmem:[%s1284_s28 + $0x10] sm:$0xf]  ;;  %v201_v43 = vsub.f32 %v169_v29, %v185_v30 }
  0x40   :  { %v411_v40 = vadd.f32 %v410_v28, %v409_v32 }
  0x41   :  { %27 = vsyncpa [#allocation3], 0  ;;  %v171_v44 = vld [vmem:[%s1283_s0 + $0x14] sm:$0xf]  ;;  %v172_v45 = vld [vmem:[%s1283_s0 + $0x18] sm:$0xf]  ;;  %v202_v49 = vsub.f32 %v170_v37, %v186_v38 }
  0x42   :  { %v187_v46 = vld [vmem:[%s1284_s28 + $0x14] sm:$0xf]  ;;  %v413_v47 = vadd.f32 %v412_v35, %v411_v40  ;;  %v188_v48 = vld [vmem:[%s1284_s28 + $0x18] sm:$0xf]  ;;  %v214_v50 = vand.u32 2147483647, %v198_v33 }
  0x43   :  { %v215_v51 = vand.u32 2147483647, %v199_v34  ;;  %v420_v52 = vsel %vm396_vm5, %v392_v17, 0.0  ;;  %v422_v53 = vsel %vm396_vm5, %v393_v18, 0.0  ;;  %v173_v54 = vld [vmem:[%s1283_s0 + $0x1c] sm:$0xf]  ;;  %v203_v59 = vsub.f32 %v171_v44, %v187_v46 }
  0x44   :  { %v216_v55 = vand.u32 2147483647, %v200_v39  ;;  %v415_v56 = vadd.f32 %v414_v36, %v413_v47  ;;  %v174_v57 = vld [vmem:[%s1283_s0 + $0x20] sm:$0xf]  ;;  %v175_v58 = vld [vmem:[%s1283_s0 + $0x24] sm:$0xf]  ;;  %v204_v0 = vsub.f32 %v172_v45, %v188_v48 }
  0x45   :  { %v217_v60 = vand.u32 2147483647, %v201_v43  ;;  %v176_v61 = vld [vmem:[%s1283_s0 + $0x28] sm:$0xf]  ;;  %v189_v62 = vld [vmem:[%s1284_s28 + $0x1c] sm:$0xf] }
  0x46   :  { %v190_v63 = vld [vmem:[%s1284_s28 + $0x20] sm:$0xf]  ;;  %v417_v1 = vadd.f32 %v416_v41, %v415_v56  ;;  %v177_v2 = vld [vmem:[%s1283_s0 + $0x2c] sm:$0xf]  ;;  %v1130_v3 = vld [vmem:[%s1283_s0 + $0x30] sm:$0xf]  ;;  %v205_v15 = vsub.f32 %v173_v54, %v189_v62 }
  0x47   :  { %v191_v4 = vld [vmem:[%s1284_s28 + $0x24] sm:$0xf]  ;;  %v218_v5 = vand.u32 2147483647, %v202_v49  ;;  %v231_v6 = vsel %vm230_vm6, %v214_v50, 0.0  ;;  %v232_v7 = vsel %vm230_vm6, %v215_v51, 0.0  ;;  %v206_v20 = vsub.f32 %v174_v57, %v190_v63 }
  0x48   :  { %v424_v8 = vsel %vm396_vm5, %v394_v24, 0.0  ;;  %v192_v9 = vld [vmem:[%s1284_s28 + $0x28] sm:$0xf]  ;;  %v193_v10 = vld [vmem:[%s1284_s28 + $0x2c] sm:$0xf]  ;;  %v233_v11 = vadd.f32 %v232_v7, %v231_v6  ;;  %v234_v12 = vsel %vm230_vm6, %v216_v55, 0.0  ;;  %v419_v13 = vadd.f32 %v418_v42, %v417_v1 }
  0x49   :  { %v1148_v14 = vld [vmem:[%s1284_s28 + $0x30] sm:$0xf]  ;;  %v219_v16 = vand.u32 2147483647, %v203_v59  ;;  %v236_v17 = vsel %vm230_vm6, %v217_v60, 0.0  ;;  %v530_v18 = vld [vmem:[%s1259_s18] sm:$0xff]  ;;  %v207_v21 = vsub.f32 %v175_v58, %v191_v4  ;;  %v208_v25 = vsub.f32 %v176_v61, %v192_v9 }
  0x4a   :  { %v426_v19 = vsel %vm396_vm5, %v395_v31, 0.0  ;;  %v235_v22 = vadd.f32 %v234_v12, %v233_v11  ;;  %v531_v23 = vld [vmem:[%s1259_s18 + $0x8] sm:$0xff]  ;;  %v421_v24 = vadd.f32 %v420_v52, %v419_v13  ;;  %v220_v26 = vand.u32 2147483647, %v204_v0  ;;  %v508_v28 = vld [vmem:[%s1257_s16] sm:$0xff] }
  0x4b   :  { %v238_v27 = vsel %vm230_vm6, %v218_v5, 0.0  ;;  %v510_v29 = vld [vmem:[%s1258_s17] sm:$0xff]  ;;  %v209_v30 = vsub.f32 %v177_v2, %v193_v10  ;;  %v210_v31 = vsub.f32 %v1130_v3, %v1148_v14  ;;  %v532_v33 = vsub.f32 1.0, %v530_v18  ;;  %v509_v38 = vld [vmem:[%s1257_s16 + $0x8] sm:$0xff]  ;;  %v179_v40 = vld [vmem:[%s1283_s0 + $0x34] sm:$0xf] }
  0x4c   :  { %v237_v32 = vadd.f32 %v236_v17, %v235_v22  ;;  %v423_v34 = vadd.f32 %v422_v53, %v421_v24  ;;  %v221_v35 = vand.u32 2147483647, %v205_v15  ;;  %v240_v36 = vsel %vm230_vm6, %v219_v16, 0.0  ;;  %v511_v39 = vld [vmem:[%s1258_s17 + $0x8] sm:$0xff]  ;;  %v195_v41 = vld [vmem:[%s1284_s28 + $0x34] sm:$0xf] }
  0x4d   :  { %v533_v37 = vsub.f32 1.0, %v531_v23  ;;  %v222_v42 = vand.u32 2147483647, %v206_v20  ;;  %v534_v44 = vmul.f32 %v532_v33, %v532_v33  ;;  %v512_v45 = vsub.f32 %v508_v28, %v510_v29  ;;  %v591_v50 = vld [vmem:[%s1262_s21] sm:$0x1] }
  0x4e   :  { %v239_v43 = vadd.f32 %v238_v27, %v237_v32  ;;  %v425_v46 = vadd.f32 %v424_v8, %v423_v34  ;;  %v223_v47 = vand.u32 2147483647, %v207_v21  ;;  %v242_v48 = vsel %vm230_vm6, %v220_v26, 0.0  ;;  %v592_v55 = vld [vmem:[%s1262_s21 + $0x1] sm:$0x1] }
  0x4f   :  { %v535_v49 = vmul.f32 %v533_v37, %v533_v37  ;;  %v536_v52 = vsel %vm139_vm1, %v534_v44, 0.0  ;;  %v513_v53 = vsub.f32 %v509_v38, %v511_v39  ;;  %v514_v54 = vand.u32 2147483647, %v512_v45  ;;  %v180_v57 = vld [vmem:[%s1283_s0 + $0x38] sm:$0xf] }
  0x50   :  { %v241_v51 = vadd.f32 %v240_v36, %v239_v43  ;;  %v427_v56 = vadd.f32 %v426_v19, %v425_v46  ;;  %v196_v58 = vld [vmem:[%s1284_s28 + $0x38] sm:$0xf]  ;;  %v224_v59 = vand.u32 2147483647, %v208_v25  ;;  %v244_v60 = vsel %vm230_vm6, %v221_v35, 0.0 }
  0x51   :  { %v537_v61 = vsel %vm139_vm1, %v535_v49, 0.0  ;;  %v225_v62 = vand.u32 2147483647, %v209_v30  ;;  %v515_v1 = vand.u32 2147483647, %v513_v53  ;;  %v211_v3 = vsub.f32 %v179_v40, %v195_v41 }
  0x52   :  { %v243_v63 = vadd.f32 %v242_v48, %v241_v51  ;;  %v538_v0 = vadd.f32 %v537_v61, %v536_v52  ;;  %v570_v2 = vld [vmem:[%s1261_s20] sm:$0x1]  ;;  %428 = vadd.xlane.f32.xlu2 %v427_v56  ;;  %v246_v4 = vsel %vm230_vm6, %v222_v42, 0.0  ;;  %v593_v5 = vsub.f32 1.0, %v591_v50  ;;  %v571_v7 = vld [vmem:[%s1261_s20 + $0x1] sm:$0x1] }
  0x53   :  { %v594_v6 = vsub.f32 1.0, %v592_v55  ;;  %v516_v9 = vsel %vm88_vm0, %v514_v54, 0.0  ;;  %v517_v10 = vsel %vm88_vm0, %v515_v1, 0.0  ;;  %vm597_vm7 = vcmask 122880   ;;  %v181_v11 = vld [vmem:[%s1283_s0 + $0x3c] sm:$0xf] }
  0x54   :  { %v245_v8 = vadd.f32 %v244_v60, %v243_v63  ;;  %539 = vadd.xlane.f32.xlu0 %v538_v0  ;;  %v197_v12 = vld [vmem:[%s1284_s28 + $0x3c] sm:$0xf]  ;;  %v248_v13 = vsel %vm230_vm6, %v223_v47, 0.0  ;;  %v595_v14 = vmul.f32 %v593_v5, %v593_v5  ;;  %v572_v16 = vsub.f32 1.0, %v570_v2  ;;  %v485_v35 = vld [vmem:[%s1255_s14] sm:$0xf] }
  0x55   :  { %v596_v15 = vmul.f32 %v594_v6, %v594_v6  ;;  %v212_v17 = vsub.f32 %v180_v57, %v196_v58  ;;  %v226_v18 = vand.u32 2147483647, %v210_v31  ;;  %v573_v20 = vsub.f32 1.0, %v571_v7  ;;  %v486_v36 = vld [vmem:[%s1255_s14 + $0x4] sm:$0xf] }
  0x56   :  { %v247_v19 = vadd.f32 %v246_v4, %v245_v8  ;;  %v250_v21 = vsel %vm230_vm6, %v224_v59, 0.0  ;;  %v518_v22 = vadd.f32 %v517_v10, %v516_v9  ;;  %v598_v23 = vsel %vm597_vm7, %v595_v14, 0.0  ;;  %v487_v38 = vld [vmem:[%s1256_s15] sm:$0xf]  ;;  %v488_v39 = vld [vmem:[%s1256_s15 + $0x4] sm:$0xf] }
  0x57   :  { %v599_v24 = vsel %vm597_vm7, %v596_v15, 0.0  ;;  %v213_v25 = vsub.f32 %v181_v11, %v197_v12  ;;  %v574_v28 = vmul.f32 %v572_v16, %v572_v16  ;;  %v227_v29 = vand.u32 2147483647, %v211_v3  ;;  %v550_v55 = vld [vmem:[%s1260_s19] sm:$0x3f] }
  0x58   :  { %v249_v26 = vadd.f32 %v248_v13, %v247_v19  ;;  %v600_v27 = vadd.f32 %v599_v24, %v598_v23  ;;  %v252_v30 = vsel %vm230_vm6, %v225_v62, 0.0  ;;  %v575_v32 = vmul.f32 %v573_v20, %v573_v20  ;;  %v551_v56 = vld [vmem:[%s1260_s19 + $0x8] sm:$0x3f] }
  0x59   :  { %vm576_vm8 = vcmask 253952   ;;  %v228_v33 = vand.u32 2147483647, %v212_v17  ;;  %v254_v31 = vsel %vm230_vm6, %v226_v18, 0.0  ;;  %v229_v42 = vand.u32 2147483647, %v213_v25 }
  0x5a   :  { %v251_v34 = vadd.f32 %v250_v21, %v249_v26  ;;  %519 = vadd.xlane.f32.xlu2 %v518_v22  ;;  %v577_v40 = vsel %vm576_vm8, %v574_v28, 0.0  ;;  %v578_v41 = vsel %vm576_vm8, %v575_v32, 0.0  ;;  %v256_v43 = vsel %vm230_vm6, %v227_v29, 0.0 }
  0x5b   :  { %v258_v45 = vsel %vm230_vm6, %v228_v33, 0.0  ;;  %v489_v46 = vsub.f32 %v485_v35, %v487_v38  ;;  %v490_v47 = vsub.f32 %v486_v36, %v488_v39  ;;  %v579_v48 = vadd.f32 %v578_v41, %v577_v40 }
  0x5c   :  { %v253_v37 = vadd.f32 %v252_v30, %v251_v34  ;;  %601 = vadd.xlane.f32.xlu0 %v600_v27  ;;  %v260_v50 = vsel %vm230_vm6, %v229_v42, 0.0  ;;  %vm493_vm9 = vcmask 257024   ;;  %v552_v59 = vsub.f32 1.0, %v550_v55 }
  0x5d   :  { %v491_v52 = vand.u32 2147483647, %v489_v46  ;;  %v492_v53 = vand.u32 2147483647, %v490_v47  ;;  %v553_v60 = vsub.f32 1.0, %v551_v56 }
  0x5e   :  { %v255_v44 = vadd.f32 %v254_v31, %v253_v37  ;;  %v554_v62 = vmul.f32 %v552_v59, %v552_v59 }
  0x5f   :  { %v494_v57 = vsel %vm493_vm9, %v491_v52, 0.0  ;;  %v495_v58 = vsel %vm493_vm9, %v492_v53, 0.0  ;;  %v555_v63 = vmul.f32 %v553_v60, %v553_v60 }
  0x60   :  { %v257_v49 = vadd.f32 %v256_v43, %v255_v44  ;;  %v496_v61 = vadd.f32 %v495_v58, %v494_v57  ;;  %v556_v0 = vsel %vm305_vm2, %v554_v62, 0.0 }
  0x61   :  { %v557_v1 = vsel %vm305_vm2, %v555_v63, 0.0 }
  0x62   :  { %v259_v51 = vadd.f32 %v258_v45, %v257_v49  ;;  %580 = vadd.xlane.f32.xlu2 %v579_v48  ;;  %v558_v2 = vadd.f32 %v557_v1, %v556_v0 }
  0x64   :  { %v261_v54 = vadd.f32 %v260_v50, %v259_v51 }
  0x66   :  { %262 = vadd.xlane.f32.xlu1 %v261_v54 }
  0x6e   :  { %497 = vadd.xlane.f32.xlu1 %v496_v61 }
  0x76   :  { %559 = vadd.xlane.f32.xlu1 %v558_v2 }
  0x8e   :  { %v97_v3 = vpop.xlane.xlu0 %96 }
  0x8f   :  { %v98_v4 = vrot.slane %v97_v3, 4 }
  0x91   :  { %v99_v5 = vadd.f32 %v98_v4, %v97_v3 }
  0x93   :  { %v100_v6 = vrot.slane %v99_v5, 2 }
  0x95   :  { %v101_v7 = vadd.f32 %v100_v6, %v99_v5 }
  0x97   :  { %v102_v8 = vrot.slane %v101_v7, 1 }
  0x99   :  { %v103_v9 = vadd.f32 %v102_v8, %v101_v7 }
  0x9b   :  { %629 = vpush %v103_v9 }
  0x9c   :  { %v156_v10 = vpop.xlane.xlu0 %155 }
  0x9d   :  { %v157_v11 = vrot.slane %v156_v10, 4 }
  0x9f   :  { %v158_v12 = vadd.f32 %v157_v11, %v156_v10 }
  0xa0   :  { %v452_v17 = vpop.xlane.xlu2 %451 }
  0xa1   :  { %v159_v13 = vrot.slane %v158_v12, 2  ;;  %v453_v24 = vrot.slane %v452_v17, 4 }
  0xa3   :  { %v160_v14 = vadd.f32 %v159_v13, %v158_v12  ;;  %v454_v29 = vadd.f32 %v453_v24, %v452_v17 }
  0xa4   :  { %v475_v19 = vpop.xlane.xlu0 %474 }
  0xa5   :  { %v161_v15 = vrot.slane %v160_v14, 1  ;;  %v322_v20 = vpop.xlane.xlu1 %321  ;;  %v476_v25 = vrot.slane %v475_v19, 4  ;;  %v455_v37 = vrot.slane %v454_v29, 2 }
  0xa6   :  { %v323_v22 = vrot.slane %v322_v20, 4 }
  0xa7   :  { %v162_v16 = vadd.f32 %v161_v15, %v160_v14  ;;  %v477_v32 = vadd.f32 %v476_v25, %v475_v19  ;;  %v456_v47 = vadd.f32 %v455_v37, %v454_v29 }
  0xa8   :  { %v324_v27 = vadd.f32 %v323_v22, %v322_v20 }
  0xa9   :  { %631 = vpush %v162_v16  ;;  %v478_v39 = vrot.slane %v477_v32, 2  ;;  %v457_v59 = vrot.slane %v456_v47, 1 }
  0xaa   :  { %v325_v34 = vrot.slane %v324_v27, 2 }
  0xab   :  { %v479_v52 = vadd.f32 %v478_v39, %v477_v32  ;;  %v458_v6 = vadd.f32 %v457_v59, %v456_v47 }
  0xac   :  { %v326_v43 = vadd.f32 %v325_v34, %v324_v27 }
  0xad   :  { %v480_v1 = vrot.slane %v479_v52, 1 }
  0xae   :  { %v327_v54 = vrot.slane %v326_v43, 1 }
  0xaf   :  { %v481_v9 = vadd.f32 %v480_v1, %v479_v52 }
  0xb0   :  { %v328_v2 = vadd.f32 %v327_v54, %v326_v43 }
  0xc5   :  { %v429_v18 = vpop.xlane.xlu2 %428 }
  0xc6   :  { %v430_v21 = vrot.slane %v429_v18, 4 }
  0xc7   :  { %v540_v28 = vpop.xlane.xlu0 %539 }
  0xc8   :  { %v431_v26 = vadd.f32 %v430_v21, %v429_v18  ;;  %v541_v36 = vrot.slane %v540_v28, 4 }
  0xca   :  { %v432_v33 = vrot.slane %v431_v26, 2  ;;  %v542_v45 = vadd.f32 %v541_v36, %v540_v28 }
  0xcc   :  { %v433_v41 = vadd.f32 %v432_v33, %v431_v26  ;;  %v543_v55 = vrot.slane %v542_v45, 2  ;;  %s630_s19 = spop %629 }
  0xcd   :  { %v520_v23 = vpop.xlane.xlu2 %519  ;;  %s105_s30 = smul.f32 0.087890625, %s630_s19 }
  0xce   :  { %v521_v30 = vrot.slane %v520_v23, 4  ;;  %v434_v51 = vrot.slane %v433_v41, 1  ;;  %v544_v5 = vadd.f32 %v543_v55, %v542_v45 }
  0xcf   :  { %v602_v48 = vpop.xlane.xlu0 %601 }
  0xd0   :  { %v522_v38 = vadd.f32 %v521_v30, %v520_v23  ;;  %v603_v58 = vrot.slane %v602_v48, 4  ;;  %v435_v0 = vadd.f32 %v434_v51, %v433_v41  ;;  %v545_v15 = vrot.slane %v544_v5, 1 }
  0xd2   :  { %v523_v46 = vrot.slane %v522_v38, 2  ;;  %v604_v4 = vadd.f32 %v603_v58, %v602_v48  ;;  %v546_v22 = vadd.f32 %v545_v15, %v544_v5 }
  0xd4   :  { %v524_v61 = vadd.f32 %v523_v46, %v522_v38  ;;  %v605_v12 = vrot.slane %v604_v4, 2 }
  0xd5   :  { %v581_v42 = vpop.xlane.xlu2 %580 }
  0xd6   :  { %v582_v49 = vrot.slane %v581_v42, 4  ;;  %v525_v8 = vrot.slane %v524_v61, 1  ;;  %v606_v20 = vadd.f32 %v605_v12, %v604_v4 }
  0xd8   :  { %v583_v60 = vadd.f32 %v582_v49, %v581_v42  ;;  %v526_v17 = vadd.f32 %v525_v8, %v524_v61  ;;  %v607_v26 = vrot.slane %v606_v20, 1 }
  0xd9   :  { %v263_v31 = vpop.xlane.xlu1 %262 }
  0xda   :  { %v264_v35 = vrot.slane %v263_v31, 4  ;;  %v584_v7 = vrot.slane %v583_v60, 2  ;;  %v608_v29 = vadd.f32 %v607_v26, %v606_v20  ;;  %s632_s7 = spop %631 }
  0xdb   :  { %s164_s16 = smul.f32 0.015625, %s632_s7 }
  0xdc   :  { %v265_v40 = vadd.f32 %v264_v35, %v263_v31  ;;  %v585_v16 = vadd.f32 %v584_v7, %v583_v60 }
  0xdd   :  { %s165_s17 = sadd.f32 %s164_s16, %s105_s30 }
  0xde   :  { %v266_v44 = vrot.slane %v265_v40, 2  ;;  %v586_v23 = vrot.slane %v585_v16, 1 }
  0xe0   :  { %v267_v50 = vadd.f32 %v266_v44, %v265_v40  ;;  %v587_v27 = vadd.f32 %v586_v23, %v585_v16 }
  0xe1   :  { %v498_v53 = vpop.xlane.xlu1 %497 }
  0xe2   :  { %v499_v56 = vrot.slane %v498_v53, 4  ;;  %v268_v57 = vrot.slane %v267_v50, 1 }
  0xe4   :  { %v500_v62 = vadd.f32 %v499_v56, %v498_v53  ;;  %v269_v63 = vadd.f32 %v268_v57, %v267_v50 }
  0xe6   :  { %v501_v3 = vrot.slane %v500_v62, 2  ;;  %633 = vpush %v269_v63 }
  0xe7   :  { %635 = vpush %v328_v2 }
  0xe8   :  { %637 = vpush %v435_v0  ;;  %v502_v10 = vadd.f32 %v501_v3, %v500_v62 }
  0xe9   :  { %639 = vpush %v458_v6  ;;  %v560_v11 = vpop.xlane.xlu1 %559 }
  0xea   :  { %641 = vpush %v481_v9  ;;  %v561_v13 = vrot.slane %v560_v11, 4  ;;  %v503_v14 = vrot.slane %v502_v10, 1 }
  0xec   :  { %v562_v18 = vadd.f32 %v561_v13, %v560_v11  ;;  %v504_v19 = vadd.f32 %v503_v14, %v502_v10 }
  0xee   :  { %v563_v21 = vrot.slane %v562_v18, 2  ;;  %643 = vpush %v504_v19 }
  0xef   :  { %645 = vpush %v526_v17 }
  0xf0   :  { %v564_v24 = vadd.f32 %v563_v21, %v562_v18  ;;  %647 = vpush %v546_v22 }
  0xf2   :  { %v565_v25 = vrot.slane %v564_v24, 1 }
  0xf4   :  { %v566_v28 = vadd.f32 %v565_v25, %v564_v24 }
  0xf6   :  { %649 = vpush %v566_v28 }
  0xf7   :  { %651 = vpush %v587_v27 }
  0xf8   :  { %653 = vpush %v608_v29 }
 0x117   :  { %s634_s4 = spop %633 }
 0x118   :  { %s271_s26 = smul.f32 0.015625, %s634_s4  ;;  %s636_s29 = spop %635 }
 0x119   :  { %s638_s10 = spop %637  ;;  %s330_s23 = smul.f32 0.013888889, %s636_s29 }
 0x11a   :  { %s272_s12 = sadd.f32 %s271_s26, %s165_s17  ;;  %s640_s21 = spop %639 }
 0x11b   :  { %s437_s24 = smul.f32 0.013888889, %s638_s10  ;;  %s642_s11 = spop %641 }
 0x11c   :  { %s331_s1 = sadd.f32 %s330_s23, %s272_s12  ;;  %s460_s6 = smul.f32 0.00390625, %s640_s21 }
 0x11d   :  { %s483_s0 = smul.f32 0.00390625, %s642_s11  ;;  %s619_s29 = sshll.u32 %s1263_s22, 4  ;;  %s620_s29 = int_to_ptr.hbm [resolvable:$true] %s619_s29 }
 0x11e   :  { %s438_s13 = sadd.f32 %s437_s24, %s331_s1  ;;  %s670_s21 = smov [#allocation2]  }
 0x11f   :  { %s644_s5 = spop %643 }
 0x120   :  { %s461_s20 = sadd.f32 %s460_s6, %s438_s13  ;;  %s646_s28 = spop %645 }
 0x121   :  { %s506_s8 = smul.f32 0.0078125, %s644_s5  ;;  %s648_s25 = spop %647 }
 0x122   :  { %s484_s18 = sadd.f32 %s483_s0, %s461_s20  ;;  %s528_s2 = smul.f32 0.0078125, %s646_s28 }
 0x123   :  { %s548_s15 = smul.f32 0.03125, %s648_s25 }
 0x124   :  { %s507_s9 = sadd.f32 %s506_s8, %s484_s18 }
 0x126   :  { %s529_s14 = sadd.f32 %s528_s2, %s507_s9 }
 0x127   :  { %s650_s27 = spop %649 }
 0x128   :  { %s549_s3 = sadd.f32 %s548_s15, %s529_s14  ;;  %s568_s19 = smul.f32 0.027777778, %s650_s27 }
 0x129   :  { %s652_s7 = spop %651 }
 0x12a   :  { %s569_s16 = sadd.f32 %s568_s19, %s549_s3  ;;  %s589_s30 = smul.f32 0.015625, %s652_s7 }
 0x12b   :  { %s654_s17 = spop %653 }
 0x12c   :  { %s590_s10 = sadd.f32 %s589_s30, %s569_s16  ;;  %s610_s12 = smul.f32 0.03125, %s654_s17 }
 0x12e   :  { %s611_s23 = sadd.f32 %s610_s12, %s590_s10 }
 0x130   :  { %613 = sst [smem:[#allocation2]] %s611_s23 }
 0x131   :  { %622 = dma.smem_to_hbm %s670_s21, 16, %s620_s29, [#allocation3]  }
 0x132   :  { %668 = dma.done.wait [#allocation3], 16  }
 0x133   :  { %669 = vsyncadd [#allocation3], 4294967280 }
 0x134   :  { %627 = sfence }
 0x135   :  { %628 = vsyncpa [#allocation3], 1 }

</bundles_post_ra>
